<compile_context>
chip_gen: v7x
topology: tpu7x:2x2x1
jax: 0.10.0
libtpu: 0.0.40
codegen_flags: <defaults>
</compile_context>

<pallas_src>
import functools

import jax
import jax.numpy as jnp
from jax import lax
from jax.experimental import pallas as pl
from jax.experimental.pallas import tpu as pltpu


def _round_up(v, m):
    return (v + m - 1) // m * m


def _supports_bf16_eup():
    # v6e / v7x have bf16 VPU/EUP paths; v5e and earlier do not.
    try:
        kind = jax.devices()[0].device_kind.lower()
    except Exception:
        return False
    return not any(t in kind for t in ("v2", "v3", "v4", "v5"))


def _self_attn_kernel(q_ref, k_ref, v_ref, xr_ref, g_ref, out_ref, *,
                      n_kv, tk, c_dim, sum_row, use_bf16_exp):
    # q tile: queries on lanes, (padded) projection channels on sublanes.
    q = q_ref[0]                                   # (Cqp, TQ) bf16
    tq = q.shape[1]
    cvp = v_ref.shape[1]

    def body(kt, carry):
        m_prev, acc = carry                        # (1, TQ) f32, (Cvp, TQ) f32
        off = pl.multiple_of(kt * tk, tk)
        k_t = k_ref[0, :, pl.ds(off, tk)]          # (Cqp, TK) bf16 (VMEM-resident)
        v_t = v_ref[0, :, pl.ds(off, tk)]          # (Cvp, TK) bf16 (VMEM-resident)

        # scores s[j, i] = sum_c k[c, j] * q[c, i]  (keys on sublanes, queries on lanes)
        s = lax.dot_general(k_t, q, (((0,), (0,)), ((), ())),
                            preferred_element_type=jnp.float32)   # (TK, TQ) f32

        # online softmax over the key axis (axis 0); stats in f32.
        m_new = jnp.maximum(m_prev, jnp.max(s, axis=0, keepdims=True))
        alpha = jnp.exp(m_prev - m_new)                            # (1, TQ) f32
        if use_bf16_exp:
            p = jnp.exp((s - m_new).astype(jnp.bfloat16))          # (TK, TQ) bf16
        else:
            p = jnp.exp(s - m_new).astype(jnp.bfloat16)            # (TK, TQ) bf16

        # value matmul; the ones row of v_t makes acc[sum_row] carry sum_j p[j, i],
        # so no separate VPU/XLU row-sum is needed.
        acc = alpha * acc + jnp.dot(v_t, p, preferred_element_type=jnp.float32)
        return m_new, acc

    m0 = jnp.full((1, tq), -jnp.inf, jnp.float32)
    acc0 = jnp.zeros((cvp, tq), jnp.float32)
    _, acc = lax.fori_loop(0, n_kv, body, (m0, acc0), unroll=(n_kv <= 8))

    inv_l = pl.reciprocal(acc[sum_row:sum_row + 1], approx=True)   # (1, TQ)
    # gamma * softmax(QK^T) V + residual, all in f32.
    out_ref[0] = g_ref[0] * (acc[:c_dim] * inv_l) + xr_ref[0]


def self_attn_pallas(x_nchw, wq, bq, wk, bk, wv, bv, gamma, *,
                     tq=512, tk=512, use_bf16_exp=None):
    """SAGAN Self_Attn forward.
    x_nchw: (B, C, W, H); wq/wk: (C//8, C, 1, 1); wv: (C, C, 1, 1); gamma scalar."""
    B, C, W, H = x_nchw.shape
    N = W * H
    tq = min(tq, N)
    tk = min(tk, N)
    assert N % tq == 0 and N % tk == 0, "W*H must be divisible by the tile sizes"
    assert tq % 128 == 0 or tq == N
    assert tk % 128 == 0 or tk == N

    if use_bf16_exp is None:
        use_bf16_exp = _supports_bf16_eup()

    cq = wq.shape[0]
    cqp = _round_up(max(cq, 1), 16)     # padded q/k projection channels (bf16 sublanes)
    cvp = _round_up(C + 1, 16)          # value rows + ones row (+ zero pad)

    # channels-first flattened activations (lane dim = N, no NCHW<->NHWC transpose).
    x32 = x_nchw.reshape(B, C, N).astype(jnp.float32)           # residual, exact f32

    wq2 = wq[:, :, 0, 0].astype(jnp.float32)
    wk2 = wk[:, :, 0, 0].astype(jnp.float32)
    wv2 = wv[:, :, 0, 0].astype(jnp.float32)

    # Exact 1x1-conv projections hoisted out of the kernel (one XLA matmul each).
    # bk is kept even though it cancels under softmax -> exact PyTorch semantics.
    q = jnp.einsum('oc,bcn->bon', wq2, x32) + bq.astype(jnp.float32)[None, :, None]
    k = jnp.einsum('oc,bcn->bon', wk2, x32) + bk.astype(jnp.float32)[None, :, None]
    v = jnp.einsum('oc,bcn->bon', wv2, x32) + bv.astype(jnp.float32)[None, :, None]

    pad_qk = jnp.zeros((B, cqp - cq, N), jnp.float32)
    q_p = jnp.concatenate([q, pad_qk], axis=1).astype(jnp.bfloat16)   # (B, Cqp, N)
    k_p = jnp.concatenate([k, pad_qk], axis=1).astype(jnp.bfloat16)   # (B, Cqp, N)
    # value slab + ones row (fuses the softmax denominator into the MXU) + zero pad.
    v_aug = jnp.concatenate(
        [v,
         jnp.ones((B, 1, N), jnp.float32),
         jnp.zeros((B, cvp - C - 1, N), jnp.float32)],
        axis=1).astype(jnp.bfloat16)                                  # (B, Cvp, N)

    g = jnp.asarray(gamma, jnp.float32).reshape(1)

    n_kv = N // tk
    kernel = functools.partial(_self_attn_kernel, n_kv=n_kv, tk=tk, c_dim=C,
                               sum_row=C, use_bf16_exp=use_bf16_exp)

    cost = pl.CostEstimate(
        flops=int(2 * B * N * N * (cqp + cvp)),
        transcendentals=int(B * N * N),
        bytes_accessed=int(B * N * (2 * cqp + 2 * cqp + 2 * cvp + 4 * C + 4 * C)))

    out = pl.pallas_call(
        kernel,
        out_shape=jax.ShapeDtypeStruct((B, C, N), jnp.float32),
        grid=(B, N // tq),
        in_specs=[
            pl.BlockSpec((1, cqp, tq), lambda b, qi: (b, 0, qi)),   # q tile
            pl.BlockSpec((1, cqp, N), lambda b, qi: (b, 0, 0)),     # k: resident per batch
            pl.BlockSpec((1, cvp, N), lambda b, qi: (b, 0, 0)),     # v(+ones): resident per batch
            pl.BlockSpec((1, C, tq), lambda b, qi: (b, 0, qi)),     # residual (f32)
            pl.BlockSpec(memory_space=pltpu.MemorySpace.SMEM),      # gamma scalar
        ],
        out_specs=pl.BlockSpec((1, C, tq), lambda b, qi: (b, 0, qi)),
        compiler_params=pltpu.CompilerParams(
            dimension_semantics=("parallel", "parallel")),
        cost_estimate=cost,
    )(q_p, k_p, v_aug, x32, g)

    return out.reshape(B, C, W, H)


def self_attn_ref(x, wq, bq, wk, bk, wv, bv, gamma):
    """Pure-JAX reference mirroring the PyTorch forward exactly."""
    B, C, W, H = x.shape
    N = W * H

    def conv1x1(x, w, b):
        return jnp.einsum('bchw,oc->bohw', x, w[:, :, 0, 0]) + b[None, :, None, None]

    proj_query = conv1x1(x, wq, bq).reshape(B, -1, N).transpose(0, 2, 1)  # (B, N, Cq)
    proj_key = conv1x1(x, wk, bk).reshape(B, -1, N)                        # (B, Cq, N)
    energy = jnp.einsum('bnc,bcm->bnm', proj_query, proj_key)              # (B, N, N)
    attention = jax.nn.softmax(energy, axis=-1)
    proj_value = conv1x1(x, wv, bv).reshape(B, -1, N)                      # (B, C, N)
    out = jnp.einsum('bcn,bmn->bcm', proj_value, attention)                # (B, C, N)
    out = out.reshape(B, C, W, H)
    return gamma * out + x


if __name__ == "__main__":
    B, C, W, H = 2, 16, 16, 16   # in_dim=16 -> query/key channels = 16 // 8 = 2

    key = jax.random.PRNGKey(0)
    kx, kwq, kbq, kwk, kbk, kwv, kbv = jax.random.split(key, 7)

    x = jax.random.normal(kx, (B, C, W, H), jnp.float32)

    Cq = C // 8
    wq = jax.random.normal(kwq, (Cq, C, 1, 1), jnp.float32) * 0.1
    bq = jax.random.normal(kbq, (Cq,), jnp.float32) * 0.1
    wk = jax.random.normal(kwk, (Cq, C, 1, 1), jnp.float32) * 0.1
    bk = jax.random.normal(kbk, (Cq,), jnp.float32) * 0.1
    wv = jax.random.normal(kwv, (C, C, 1, 1), jnp.float32) * 0.1
    bv = jax.random.normal(kbv, (C,), jnp.float32) * 0.1
    # Module inits gamma to 0 (which would make out == input trivially);
    # use a nonzero deterministic value to exercise the attention path.
    gamma = 0.5

    # tq = tk = 128 with N = 256 -> grid (B, 2) with a 2-step in-kernel key loop:
    # exercises the multi-tile online-softmax path and both parallel grid axes.
    out = self_attn_pallas(x, wq, bq, wk, bk, wv, bv, gamma, tq=128, tk=128)
    out = jax.block_until_ready(out)

    ref = self_attn_ref(x, wq, bq, wk, bk, wv, bv, gamma)
    assert out.shape == (B, C, W, H)
    # bf16 MXU operands (+ possibly bf16 exp) + approx reciprocal -> loose tolerance.
    assert jnp.allclose(out, ref, atol=2e-2, rtol=2e-2), "mismatch vs reference"

    print("KERNEL_OK")
</pallas_src>

<mosaic_0001>
module attributes {stable_mosaic.version = 11 : i64} {
  func.func @_self_attn_kernel(%arg0: i32, %arg1: i32, %arg2: memref<1x16x128xbf16, #tpu.memory_space<vmem>>, %arg3: memref<1x16x256xbf16, #tpu.memory_space<vmem>>, %arg4: memref<1x32x256xbf16, #tpu.memory_space<vmem>>, %arg5: memref<1x16x128xf32, #tpu.memory_space<vmem>>, %arg6: memref<1xf32, #tpu.memory_space<smem>>, %arg7: memref<1x16x128xf32, #tpu.memory_space<vmem>>) attributes {dimension_semantics = [#tpu.dimension_semantics<parallel>, #tpu.dimension_semantics<parallel>], iteration_bounds = array<i64: 2, 2>, scalar_prefetch = 0 : i64, scratch_operands = 0 : i64, tpu.core_type = #tpu.core_type<tc>, window_params = [{transform_indices = @transform_0, window_bounds = array<i64: 1, 16, 128>}, {transform_indices = @transform_1, window_bounds = array<i64: 1, 16, 256>}, {transform_indices = @transform_2, window_bounds = array<i64: 1, 32, 256>}, {transform_indices = @transform_3, window_bounds = array<i64: 1, 16, 128>}, {transform_indices = @transform_4, window_bounds = array<i64: 1>}, {transform_indices = @transform_5, window_bounds = array<i64: 1, 16, 128>}]} {
    %c0 = arith.constant 0 : index
    %c0_0 = arith.constant 0 : index
    %c0_1 = arith.constant 0 : index
    %0 = vector.load %arg2[%c0, %c0_0, %c0_1] : memref<1x16x128xbf16, #tpu.memory_space<vmem>>, vector<1x16x128xbf16>
    %1 = vector.shape_cast %0 : vector<1x16x128xbf16> to vector<16x128xbf16>
    %cst = arith.constant 0xFF800000 : f32
    %2 = vector.broadcast %cst : f32 to vector<1x128xf32>
    %cst_2 = arith.constant 0.000000e+00 : f32
    %3 = vector.broadcast %cst_2 : f32 to vector<32x128xf32>
    %c0_i32 = arith.constant 0 : i32
    %c128_i32 = arith.constant 128 : i32
    %4 = arith.muli %c0_i32, %c128_i32 : i32
    %5 = tpu.assume_multiple %4, 128 : i32
    %c0_3 = arith.constant 0 : index
    %c0_4 = arith.constant 0 : index
    %6 = arith.index_cast %5 : i32 to index
    %7 = vector.load %arg3[%c0_3, %c0_4, %6] : memref<1x16x256xbf16, #tpu.memory_space<vmem>>, vector<1x16x128xbf16>
    %8 = vector.shape_cast %7 : vector<1x16x128xbf16> to vector<16x128xbf16>
    %c0_5 = arith.constant 0 : index
    %c0_6 = arith.constant 0 : index
    %9 = arith.index_cast %5 : i32 to index
    %10 = vector.load %arg4[%c0_5, %c0_6, %9] : memref<1x32x256xbf16, #tpu.memory_space<vmem>>, vector<1x32x128xbf16>
    %11 = vector.shape_cast %10 : vector<1x32x128xbf16> to vector<32x128xbf16>
    %cst_7 = arith.constant dense<0.000000e+00> : vector<128x128xf32>
    %12 = tpu.matmul %8, %1, %cst_7 {dimension_numbers = #tpu.dot_dimension_numbers<[0], [0], [1], [1], [0, 1, 1, 1], [], []>} : vector<16x128xbf16>, vector<16x128xbf16>, vector<128x128xf32> -> vector<128x128xf32>
    %cst_8 = arith.constant dense<0xFF800000> : vector<128xf32>
    %13 = vector.multi_reduction <maximumf>, %12, %cst_8 [0] : vector<128x128xf32> to vector<128xf32>
    %14 = vector.shape_cast %13 : vector<128xf32> to vector<1x128xf32>
    %15 = arith.maximumf %2, %14 : vector<1x128xf32>
    %16 = arith.subf %2, %15 : vector<1x128xf32>
    %17 = math.exp %16 : vector<1x128xf32>
    %18 = vector.broadcast %15 : vector<1x128xf32> to vector<128x128xf32>
    %19 = arith.subf %12, %18 : vector<128x128xf32>
    %20 = arith.truncf %19 : vector<128x128xf32> to vector<128x128xbf16>
    %21 = math.exp %20 : vector<128x128xbf16>
    %22 = vector.broadcast %17 : vector<1x128xf32> to vector<32x128xf32>
    %23 = arith.mulf %22, %3 : vector<32x128xf32>
    %cst_9 = arith.constant dense<0.000000e+00> : vector<32x128xf32>
    %24 = tpu.matmul %11, %21, %cst_9 {dimension_numbers = #tpu.dot_dimension_numbers<[1], [0], [0], [1], [0, 0, 1, 1], [], []>} : vector<32x128xbf16>, vector<128x128xbf16>, vector<32x128xf32> -> vector<32x128xf32>
    %25 = arith.addf %23, %24 : vector<32x128xf32>
    %c1_i32 = arith.constant 1 : i32
    %c128_i32_10 = arith.constant 128 : i32
    %26 = arith.muli %c1_i32, %c128_i32_10 : i32
    %27 = tpu.assume_multiple %26, 128 : i32
    %c0_11 = arith.constant 0 : index
    %c0_12 = arith.constant 0 : index
    %28 = arith.index_cast %27 : i32 to index
    %29 = vector.load %arg3[%c0_11, %c0_12, %28] : memref<1x16x256xbf16, #tpu.memory_space<vmem>>, vector<1x16x128xbf16>
    %30 = vector.shape_cast %29 : vector<1x16x128xbf16> to vector<16x128xbf16>
    %c0_13 = arith.constant 0 : index
    %c0_14 = arith.constant 0 : index
    %31 = arith.index_cast %27 : i32 to index
    %32 = vector.load %arg4[%c0_13, %c0_14, %31] : memref<1x32x256xbf16, #tpu.memory_space<vmem>>, vector<1x32x128xbf16>
    %33 = vector.shape_cast %32 : vector<1x32x128xbf16> to vector<32x128xbf16>
    %cst_15 = arith.constant dense<0.000000e+00> : vector<128x128xf32>
    %34 = tpu.matmul %30, %1, %cst_15 {dimension_numbers = #tpu.dot_dimension_numbers<[0], [0], [1], [1], [0, 1, 1, 1], [], []>} : vector<16x128xbf16>, vector<16x128xbf16>, vector<128x128xf32> -> vector<128x128xf32>
    %cst_16 = arith.constant dense<0xFF800000> : vector<128xf32>
    %35 = vector.multi_reduction <maximumf>, %34, %cst_16 [0] : vector<128x128xf32> to vector<128xf32>
    %36 = vector.shape_cast %35 : vector<128xf32> to vector<1x128xf32>
    %37 = arith.maximumf %15, %36 : vector<1x128xf32>
    %38 = arith.subf %15, %37 : vector<1x128xf32>
    %39 = math.exp %38 : vector<1x128xf32>
    %40 = vector.broadcast %37 : vector<1x128xf32> to vector<128x128xf32>
    %41 = arith.subf %34, %40 : vector<128x128xf32>
    %42 = arith.truncf %41 : vector<128x128xf32> to vector<128x128xbf16>
    %43 = math.exp %42 : vector<128x128xbf16>
    %44 = vector.broadcast %39 : vector<1x128xf32> to vector<32x128xf32>
    %45 = arith.mulf %44, %25 : vector<32x128xf32>
    %cst_17 = arith.constant dense<0.000000e+00> : vector<32x128xf32>
    %46 = tpu.matmul %33, %43, %cst_17 {dimension_numbers = #tpu.dot_dimension_numbers<[1], [0], [0], [1], [0, 0, 1, 1], [], []>} : vector<32x128xbf16>, vector<128x128xbf16>, vector<32x128xf32> -> vector<32x128xf32>
    %47 = arith.addf %45, %46 : vector<32x128xf32>
    %c2_i32 = arith.constant 2 : i32
    %48 = vector.extract_strided_slice %47 {offsets = [16, 0], sizes = [1, 128], strides = [1, 1]} : vector<32x128xf32> to vector<1x128xf32>
    %49 = tpu.reciprocal %48 {approx = true} : vector<1x128xf32> -> vector<1x128xf32>
    %c0_18 = arith.constant 0 : index
    %50 = memref.load %arg6[%c0_18] : memref<1xf32, #tpu.memory_space<smem>>
    %51 = vector.extract_strided_slice %47 {offsets = [0, 0], sizes = [16, 128], strides = [1, 1]} : vector<32x128xf32> to vector<16x128xf32>
    %52 = vector.broadcast %49 : vector<1x128xf32> to vector<16x128xf32>
    %53 = arith.mulf %51, %52 : vector<16x128xf32>
    %54 = vector.broadcast %50 : f32 to vector<16x128xf32>
    %55 = arith.mulf %54, %53 : vector<16x128xf32>
    %c0_19 = arith.constant 0 : index
    %c0_20 = arith.constant 0 : index
    %c0_21 = arith.constant 0 : index
    %56 = vector.load %arg5[%c0_19, %c0_20, %c0_21] : memref<1x16x128xf32, #tpu.memory_space<vmem>>, vector<1x16x128xf32>
    %57 = vector.shape_cast %56 : vector<1x16x128xf32> to vector<16x128xf32>
    %58 = arith.addf %55, %57 : vector<16x128xf32>
    %c0_22 = arith.constant 0 : index
    %c0_23 = arith.constant 0 : index
    %c0_24 = arith.constant 0 : index
    %59 = vector.load %arg7[%c0_22, %c0_23, %c0_24] : memref<1x16x128xf32, #tpu.memory_space<vmem>>, vector<1x16x128xf32>
    %60 = vector.shape_cast %59 : vector<1x16x128xf32> to vector<16x128xf32>
    %61 = vector.shape_cast %58 : vector<16x128xf32> to vector<1x16x128xf32>
    tpu.vector_store %arg7[%c0_22, %c0_23, %c0_24], %61 {strides = array<i32>} : memref<1x16x128xf32, #tpu.memory_space<vmem>>, vector<1x16x128xf32>,
    return
  }
  func.func @transform_0(%arg0: i32, %arg1: i32) -> (i32, i32, i32) {
    %c0_i32 = arith.constant 0 : i32
    %c0_i32_0 = arith.constant 0 : i32
    return %arg0, %c0_i32, %arg1 : i32, i32, i32
  }
  func.func @transform_1(%arg0: i32, %arg1: i32) -> (i32, i32, i32) {
    %c0_i32 = arith.constant 0 : i32
    %c0_i32_0 = arith.constant 0 : i32
    %c0_i32_1 = arith.constant 0 : i32
    return %arg0, %c0_i32, %c0_i32_0 : i32, i32, i32
  }
  func.func @transform_2(%arg0: i32, %arg1: i32) -> (i32, i32, i32) {
    %c0_i32 = arith.constant 0 : i32
    %c0_i32_0 = arith.constant 0 : i32
    %c0_i32_1 = arith.constant 0 : i32
    return %arg0, %c0_i32, %c0_i32_0 : i32, i32, i32
  }
  func.func @transform_3(%arg0: i32, %arg1: i32) -> (i32, i32, i32) {
    %c0_i32 = arith.constant 0 : i32
    %c0_i32_0 = arith.constant 0 : i32
    return %arg0, %c0_i32, %arg1 : i32, i32, i32
  }
  func.func @transform_4(%arg0: i32, %arg1: i32) -> i32 {
    %c0_i32 = arith.constant 0 : i32
    %c0_i32_0 = arith.constant 0 : i32
    return %c0_i32 : i32
  }
  func.func @transform_5(%arg0: i32, %arg1: i32) -> (i32, i32, i32) {
    %c0_i32 = arith.constant 0 : i32
    %c0_i32_0 = arith.constant 0 : i32
    return %arg0, %c0_i32, %arg1 : i32, i32, i32
  }
}

</mosaic_0001>

<bundles_post_ra>
// kernel: tpu_custom_call.1
= control target key start
LH: loop header
LB: loop body
LE: loop exit
PB: predicated region body
PF: predicated region fallthrough
CT: control target
= control target key end

     0   :  { %s2356_s0 = inlined_call_operand.hbm [shape: bf16[2,16,256], index: 0, kind: input, shape index: {}]   ;;  %s2357_s1 = inlined_call_operand.hbm [shape: bf16[2,16,256], index: 1, kind: input, shape index: {}]   ;;  %s2358_s2 = inlined_call_operand.hbm [shape: bf16[2,32,256], index: 2, kind: input, shape index: {}]   ;;  %s2359_s3 = inlined_call_operand.hbm [shape: f32[2,16,256], index: 3, kind: input, shape index: {}]   ;;  %s2360_s4 = inlined_call_operand.<no memory space> [shape: f32[1], index: 4, kind: input, shape index: {}]   ;;  %s2361_s5 = inlined_call_operand.hbm [shape: f32[2,16,256], index: 5, kind: output, shape index: {}]  }
   0x1   :  { %2386 = sst [smem:[#allocation27_spill]] %s2357_s1 }
   0x2   :  { %2387 = sst [smem:[#allocation28_spill]] %s2361_s5 }
   0x3   :  { %10 = sst [smem:[#allocation2]] %s2360_s4 }
   0x4   :  { %11 = vsyncpa [#allocation4], 0 }
   0x5   :  { %13 = vsyncpa [#allocation4 + $0x1], 0 }
   0x6   :  { %14 = vsyncpa [#allocation7], 0 }
   0x7   :  { %16 = vsyncpa [#allocation7 + $0x1], 0 }
   0x8   :  { %17 = vsyncpa [#allocation10], 0 }
   0x9   :  { %19 = vsyncpa [#allocation10 + $0x1], 0 }
   0xa   :  { %20 = vsyncpa [#allocation5], 0 }
   0xb   :  { %22 = vsyncpa [#allocation5 + $0x1], 0  ;;  %s1795_s20 = smov 0   ;;  %s1797_s21 = smov 0  }
   0xc   :  { %s1799_s22 = smov 0   ;;  %s1801_s23 = smov 0  }
   0xd   :  { %s1803_s24 = smov 0   ;;  %s1805_s25 = smov 0  }
   0xe   :  { %s1807_s4 = smov 0   ;;  %s1809_s26 = smov 0  }
   0xf   :  { %s1811_s27 = smov 0   ;;  %s1813_s28 = smov 0  }
  0x10   :  { %s1815_s29 = smov 0  }
  0x11 LB: > { %2388 = sst [smem:[#allocation16_spill]] %s1711_s21  ;;  %s1849_s30 = sadd.s32 4294967295, %s1747_s29   ;;  %s1747_s29 = sphi %s1815_s29, %s28_s29   ;;  %s1743_s28 = sphi %s1813_s28, %s2436_s28   ;;  %s1739_s27 = sphi %s1811_s27, %s2443_s27   ;;  %s1735_s26 = sphi %s1809_s26, %s2434_s26   ;;  %s1731_s4 = sphi %s1807_s4, %s2442_s4   ;;  %s1727_s25 = sphi %s1805_s25, %s2441_s25   ;;  %s1723_s24 = sphi %s1803_s24, %s2440_s24   ;;  %s1719_s23 = sphi %s1801_s23, %s2439_s23   ;;  %s1715_s22 = sphi %s1799_s22, %s2438_s22   ;;  %s1711_s21 = sphi %s1797_s21, %s2437_s21   ;;  %s1707_s20 = sphi %s1795_s20, %s2433_s20  }
  0x12   : > { %2389 = sst [smem:[#allocation17_spill]] %s1719_s23  ;;  %p2364_p0 = scmp.eq.s32.totalorder %s1747_s29, 0 }
  0x13   : > { %2390 = sst [smem:[#allocation18_spill]] %s1731_s4  ;;  %p2363_p1 = scmp.eq.s32.totalorder %s1849_s30, 0 }
  0x14   : > { %2391 = sst [smem:[#allocation19_spill]] %s1735_s26  ;;  %p82_p2 = scmp.ne.s32.totalorder %s1715_s22, %s1711_s21 }
  0x15   : > { %2392 = sst [smem:[#allocation20_spill]] %s1743_s28  ;;  %p88_p3 = scmp.ne.s32.totalorder %s1711_s21, %s1707_s20 }
  0x16   : > { %2393 = sst [smem:[#allocation21_spill]] %s1849_s30  ;;  %p84_p5 = por %p82_p2, %p2364_p0 }
  0x17   : > { %p1862_p6 = por %p88_p3, %p2363_p1  ;;  %p2362_p7 = scmp.lt.s32.totalorder %s1747_s29, 4 }
  0x18   : > { %s240_s8 = sand.u32 1, %s1747_s29   ;;  %s242_s9 = sand.u32 1, %s1715_s22  }
  0x19   : > { %s2394_s7 = scalar_select %p1862_p6, 1, 0 }
  0x1a   : > { %s1161_s10 = sshll.u32 %s242_s9, 4  ;;  %s1210_s11 = sshll.u32 %s1743_s28, 8 }
  0x1b   : > { %2395 = sst [smem:[#allocation22_spill]] %s2394_s7  ;;  %s2396_s1 = sld [smem:[#allocation27_spill]] }
  0x1c   : > { %s244_s15 = scalar_lea.vmem [#allocation6], %s1161_s10  ;;  %p1879_p8 = pnand %p2362_p7, %p84_p5 }
  0x1d   : > { %s251_s16 = sshll.u32 %s244_s15, 4  ;;  %s1883_s18 = sshll.u32 %s242_s9, 5  ;;  %s1875_s16 = int_to_ptr.vmem [resolvable:$true] %s251_s16 }
  0x1e   : > { %s1885_s19 = scalar_lea.sflag [#allocation7], %s240_s8  ;;  %p2381_p10 = pneg %p1879_p8 }
  0x21   : > { %s1873_s14 = scalar_lea.hbm %s2396_s1, %s1210_s11  ;;  %s1502_s12 = scalar_lea.hbm %s2396_s1, 512 }
  0x22   : > { %s1497_s20 = scalar_lea.hbm %s1873_s14, 256  ;;  %p1503_p13 = scmp.lt.u32.totalorder %s1873_s14, %s2396_s1 }
  0x23   : > { %p1498_p9 = scmp.ne.s32.totalorder %s1873_s14, %s1497_s20  ;;  %p1504_p2 = scmp.lt.u32.totalorder %s1502_s12, %s1497_s20 }
  0x24   : > { %p1506_p5 = scmp.lt.u32.totalorder %s1497_s20, %s1873_s14 }
  0x25   : > { %p1500_p11 = pnand %p2381_p10, %p1498_p9  ;;  %p1505_p3 = por %p1504_p2, %p1503_p13 }
  0x27   : > { %p1501_p12 = pneg %p1500_p11  ;;  %p1507_p7 = por %p1506_p5, %p1505_p3 }
  0x29   : > { %p1508_p1 = pnand %p1507_p7, %p1501_p12 }
  0x2b   : > { %1511 = shalt.err (!%p1508_p1)
}
  0x2c   : > { %s1512_s8 = scalar_lea.vmem %s1875_s16, 256  ;;  %s1749_s9 = smov [#allocation6]  }
  0x2d   : > { %p1513_p9 = scmp.ne.s32.totalorder %s1875_s16, %s1512_s8  ;;  %s1517_s10 = sshll.u32 %s1749_s9, 4  ;;  %s1518_s10 = int_to_ptr.vmem [resolvable:$false] %s1517_s10 }
  0x2e   : > { %s1519_s11 = scalar_lea.vmem %s1518_s10, 512  ;;  %p1520_p0 = scmp.lt.s32.totalorder %s1875_s16, %s1518_s10 }
  0x2f   : > { %p1515_p11 = pnand %p1513_p9, %p2381_p10  ;;  %p1521_p13 = scmp.lt.s32.totalorder %s1519_s11, %s1512_s8 }
  0x31   : > { %p1516_p4 = pneg %p1515_p11  ;;  %p1522_p2 = por %p1521_p13, %p1520_p0 }
  0x33   : > { %p1523_p3 = pnand %p1522_p2, %p1516_p4 }
  0x35   : > { %1526 = shalt.err (!%p1523_p3)
}
  0x36   : > { %s2367_s20 = smov 128   ;;  %s2365_s12 = smov 8  }
  0x37   : > { %1342 = dma.hbm_to_vmem [thread:$0]  (!%p1879_p8), %s1873_s14, 256, %s1875_s16, %s1885_s19, %s2367_s20, %s2367_s20, %s2365_s12  }
  0x38   : > { %s265_s13 = scalar_lea.vmem [#allocation8], %s1883_s18  ;;  %p1170_p0 = scmp.ge.s32.totalorder %s1747_s29, 1 }
  0x39   : > { %s1917_s15 = sshll.u32 %s265_s13, 4  ;;  %p302_p1 = scmp.lt.s32.totalorder %s1747_s29, 5  ;;  %s2032_s15 = int_to_ptr.vmem [resolvable:$true] %s1917_s15 }
  0x3a   : > { %s1155_s9 = sadd.s32 4294967294, %s1747_s29   ;;  %s37_s10 = sadd.s32 1, %s1739_s27 }
  0x3b   : > { %p1921_p4 = pnand %p1170_p0, %p302_p1  ;;  %p38_p7 = scmp.ge.s32.totalorder %s37_s10, 2 }
  0x3c   : > { %s40_s11 = sadd.s32 1, %s1743_s28  ;;  %s49_s14 = sadd.s32 1, %s1727_s25 }
  0x3d   : > { %s2398_s8 = scalar_select %p1921_p4, 1, 0 }
  0x3e   : > { %p56_p12 = scmp.ne.s32.totalorder %s1727_s25, %s1723_s24  ;;  %s2445_s10 = smov (%p38_p7, %s37_s10), 0 }
  0x3f   : > { %2399 = sst [smem:[#allocation23_spill]] %s2445_s10  ;;  %s2447_s11 = smov (!%p38_p7, %s40_s11), %s1743_s28 }
  0x40   : > { %s45_s16 = ssub.s32 %s1739_s27, %s2445_s10  ;;  %p2400_p5 = scmp.eq.s32.totalorder %s1747_s29, 0 }
  0x41   : > { %p42_p11 = scmp.ge.s32.totalorder %s2447_s11, 2  ;;  %p62_p13 = scmp.ne.s32.totalorder %s1723_s24, %s1719_s23 }
  0x42   : > { %p1938_p9 = por %p2400_p5, %p56_p12  ;;  %p2402_p2 = scmp.eq.s32.totalorder %s1849_s30, 3 }
  0x43   : > { %p195_p0 = scmp.eq.s32.totalorder %s1155_s9, 3  ;;  %s2449_s11 = smov (%p42_p11, %s2447_s11), 0 }
  0x44   : > { %p1946_p3 = por %p2402_p2, %p56_p12  ;;  %2405 = sst [smem:[#allocation25_spill]] %s2449_s11 }
  0x45   : > { %p2406_p1 = scmp.eq.s32.totalorder %s1849_s30, 0  ;;  %p1958_p5 = por %p195_p0, %p62_p13 }
  0x46   : > { %s2403_s13 = scalar_select %p1946_p3, 1, 0 }
  0x47   : > { %p1954_p7 = por %p2406_p1, %p62_p13  ;;  %s44_s6 = ssub.s32 %s1743_s28, %s2449_s11 }
  0x48   : > { %2404 = sst [smem:[#allocation24_spill]] %s2403_s13  ;;  %s1965_s1 = sand.u32 1, %s1727_s25  }
  0x49   : > { %s2407_s12 = scalar_select %p1954_p7, 1, 0 }
  0x4a   : > { %s2408_s20 = scalar_select %p1958_p5, 1, 0 }
  0x4b   : > { %s46_s9 = sor.u32 %s45_s16, %s44_s6  ;;  %p73_p12 = scmp.eq.s32.totalorder %s44_s6, 0 }
  0x4c   : > { %2409 = sst [smem:[#allocation26_spill]] %s2408_s20  ;;  %p47_p11 = scmp.eq.s32.totalorder %s46_s9, 0 }
  0x4d   : > { %s2410_s10 = sadd.s32 1, %s1715_s22  ;;  %s1158_s13 = sshll.u32 %s1965_s1, 3 }
  0x4e   : > { %s1970_s23 = scalar_select %p73_p12, %s1715_s22, %s2410_s10  }
  0x4f   : > { %s1973_s5 = scalar_select %p47_p11, %s1727_s25, %s49_s14  }
  0x50   : > { %s1159_s4 = sshll.u32 %s1743_s28, 2  ;;  %s222_s11 = scalar_lea.vmem [#allocation3], %s1158_s13 }
  0x51   : > { %s1978_s26 = sadd.s32 %s1739_s27, %s1159_s4  ;;  %s230_s7 = sshll.u32 %s222_s11, 4  ;;  %s1986_s7 = int_to_ptr.vmem [resolvable:$true] %s230_s7 }
  0x52   : > { %s1160_s20 = sshll.u32 %s1978_s26, 6  ;;  %p2411_p13 = scmp.lt.s32.totalorder %s1747_s29, 4 }
  0x53   : > { %s1984_s16 = scalar_lea.hbm %s2356_s0, %s1160_s20  ;;  %s1211_s6 = sshll.u32 %s1743_s28, 9 }
  0x54   : > { %p1992_p2 = pnand %p2411_p13, %p1938_p9  ;;  %s2000_s21 = scalar_lea.hbm %s2358_s2, %s1211_s6 }
  0x55   : > { %s219_s30 = scalar_lea.sflag [#allocation4], %s1965_s1  ;;  %s1527_s20 = scalar_lea.hbm %s1984_s16, 128 }
  0x56   : > { %p1528_p0 = scmp.ne.s32.totalorder %s1984_s16, %s1527_s20  ;;  %p2385_p1 = pneg %p1992_p2 }
  0x57   : > { %s1532_s13 = scalar_lea.hbm %s2356_s0, 512  ;;  %p1533_p11 = scmp.lt.u32.totalorder %s1984_s16, %s2356_s0 }
  0x58   : > { %p1530_p12 = pnand %p2385_p1, %p1528_p0  ;;  %p1534_p13 = scmp.lt.u32.totalorder %s1532_s13, %s1527_s20 }
  0x59   : > { %p1536_p5 = scmp.lt.u32.totalorder %s1527_s20, %s1984_s16 }
  0x5a   : > { %p1531_p9 = pneg %p1530_p12  ;;  %p1535_p10 = por %p1534_p13, %p1533_p11 }
  0x5c   : > { %p1537_p3 = por %p1536_p5, %p1535_p10 }
  0x5e   : > { %p1538_p6 = pnand %p1537_p3, %p1531_p9 }
  0x60   : > { %1541 = shalt.err (!%p1538_p6)
}
  0x61   : > { %s1542_s6 = scalar_lea.vmem %s1986_s7, 128  ;;  %s1752_s10 = smov [#allocation3]  }
  0x62   : > { %p1543_p0 = scmp.ne.s32.totalorder %s1986_s7, %s1542_s6  ;;  %s1547_s11 = sshll.u32 %s1752_s10, 4  ;;  %s1548_s11 = int_to_ptr.vmem [resolvable:$false] %s1547_s11 }
  0x63   : > { %s1549_s28 = scalar_lea.vmem %s1548_s11, 256  ;;  %p1550_p4 = scmp.lt.s32.totalorder %s1986_s7, %s1548_s11 }
  0x64   : > { %p1545_p12 = pnand %p1543_p0, %p2385_p1  ;;  %p1551_p11 = scmp.lt.s32.totalorder %s1549_s28, %s1542_s6 }
  0x66   : > { %p1546_p7 = pneg %p1545_p12  ;;  %p1552_p13 = por %p1551_p11, %p1550_p4 }
  0x68   : > { %p1553_p10 = pnand %p1552_p13, %p1546_p7 }
  0x6a   : > { %1556 = shalt.err (!%p1553_p10)
}
  0x6b   : > { %s1753_s20 = smov 64   ;;  %s1754_s14 = smov 4  }
  0x6c   : > { %s2413_s18 = smov 128   ;;  %s1557_s13 = scalar_lea.hbm %s2000_s21, 512 }
  0x6d   : > { %1339 = dma.hbm_to_vmem [thread:$0]  (!%p1992_p2), %s1984_s16, 128, %s1986_s7, %s219_s30, %s2413_s18, %s1753_s20, %s1754_s14  }
  0x6e   : > { %p1558_p6 = scmp.ne.s32.totalorder %s2000_s21, %s1557_s13  ;;  %p2414_p4 = pneg %p1879_p8 }
  0x6f   : > { %s1562_s10 = scalar_lea.hbm %s2358_s2, 1024  ;;  %p1563_p5 = scmp.lt.u32.totalorder %s2000_s21, %s2358_s2 }
  0x70   : > { %p1560_p3 = pnand %p1558_p6, %p2414_p4  ;;  %p1564_p9 = scmp.lt.u32.totalorder %s1562_s10, %s1557_s13 }
  0x71   : > { %p1566_p12 = scmp.lt.u32.totalorder %s1557_s13, %s2000_s21 }
  0x72   : > { %p1561_p7 = pneg %p1560_p3  ;;  %p1565_p0 = por %p1564_p9, %p1563_p5 }
  0x74   : > { %p1567_p11 = por %p1566_p12, %p1565_p0 }
  0x76   : > { %p1568_p13 = pnand %p1567_p11, %p1561_p7 }
  0x78   : > { %1571 = shalt.err (!%p1568_p13)
}
  0x79   : > { %s1572_s7 = scalar_lea.vmem %s2032_s15, 512  ;;  %p2415_p6 = pmov %p2414_p4 }
  0x7a   : > { %p1573_p10 = scmp.ne.s32.totalorder %s2032_s15, %s1572_s7  ;;  %s1755_s16 = smov [#allocation8]  }
  0x7b   : > { %s1577_s30 = sshll.u32 %s1755_s16, 4  ;;  %s1578_s30 = int_to_ptr.vmem [resolvable:$false] %s1577_s30 }
  0x7c   : > { %p1575_p4 = pnand %p1573_p10, %p2415_p6  ;;  %s1579_s20 = scalar_lea.vmem %s1578_s30, 1024 }
  0x7d   : > { %p1580_p1 = scmp.lt.s32.totalorder %s2032_s15, %s1578_s30  ;;  %p1581_p5 = scmp.lt.s32.totalorder %s1579_s20, %s1572_s7 }
  0x7e   : > { %p1576_p3 = pneg %p1575_p4 }
  0x7f   : > { %p1582_p9 = por %p1581_p5, %p1580_p1 }
  0x81   : > { %p1583_p0 = pnand %p1582_p9, %p1576_p3 }
  0x83   : > { %1586 = shalt.err (!%p1583_p0)
}
  0x84   : > { %s2416_s14 = smov 8   ;;  %s1167_s13 = sshll.u32 %s1965_s1, 4 }
  0x85   : > { %1345 = dma.hbm_to_vmem [thread:$0]  (!%p1879_p8), %s2000_s21, 512, %s2032_s15, %s1885_s19, %s2413_s18, %s2413_s18, %s2416_s14  }
  0x86   : > { %s1169_s9 = sshll.u32 %s1978_s26, 7  ;;  %s286_s17 = scalar_lea.vmem [#allocation9], %s1167_s13 }
  0x87   : > { %s2066_s11 = scalar_lea.hbm %s2359_s3, %s1169_s9  ;;  %s294_s28 = sshll.u32 %s286_s17, 4  ;;  %s2068_s28 = int_to_ptr.vmem [resolvable:$true] %s294_s28 }
  0x88   : > { %s283_s7 = scalar_lea.sflag [#allocation10], %s1965_s1  ;;  %s1587_s16 = scalar_lea.hbm %s2066_s11, 256 }
  0x89   : > { %p1588_p1 = scmp.ne.s32.totalorder %s2066_s11, %s1587_s16  ;;  %p2417_p8 = pneg %p1992_p2 }
  0x8a   : > { %s1592_s15 = scalar_lea.hbm %s2359_s3, 1024  ;;  %p1593_p11 = scmp.lt.u32.totalorder %s2066_s11, %s2359_s3 }
  0x8b   : > { %p1590_p7 = pnand %p1588_p1, %p2417_p8  ;;  %p1594_p13 = scmp.lt.u32.totalorder %s1592_s15, %s1587_s16 }
  0x8c   : > { %p1596_p6 = scmp.lt.u32.totalorder %s1587_s16, %s2066_s11 }
  0x8d   : > { %p1591_p12 = pneg %p1590_p7  ;;  %p1595_p10 = por %p1594_p13, %p1593_p11 }
  0x8f   : > { %p1597_p4 = por %p1596_p6, %p1595_p10 }
  0x91   : > { %p1598_p3 = pnand %p1597_p4, %p1591_p12 }
  0x93   : > { %1601 = shalt.err (!%p1598_p3)
}
  0x94   : > { %s1602_s20 = scalar_lea.vmem %s2068_s28, 256  ;;  %p2418_p9 = pmov %p2417_p8 }
  0x95   : > { %p1603_p5 = scmp.ne.s32.totalorder %s2068_s28, %s1602_s20  ;;  %s1756_s13 = smov [#allocation9]  }
  0x96   : > { %s1607_s9 = sshll.u32 %s1756_s13, 4  ;;  %s1608_s9 = int_to_ptr.vmem [resolvable:$false] %s1607_s9 }
  0x97   : > { %p1605_p0 = pnand %p1603_p5, %p2418_p9  ;;  %s1609_s6 = scalar_lea.vmem %s1608_s9, 512 }
  0x98   : > { %p1610_p8 = scmp.lt.s32.totalorder %s2068_s28, %s1608_s9  ;;  %p1611_p7 = scmp.lt.s32.totalorder %s1609_s6, %s1602_s20 }
  0x99   : > { %p1606_p1 = pneg %p1605_p0 }
  0x9a   : > { %p1612_p11 = por %p1611_p7, %p1610_p8 }
  0x9c   : > { %p1613_p13 = pnand %p1612_p11, %p1606_p1 }
  0x9e   : > { %1616 = shalt.err (!%p1613_p13)
}
  0x9f   : > { %s1757_s10 = smov 256   ;;  %p2419_p12 = scmp.ne.s32.totalorder %s2398_s8, 0 }
  0xa0   : > { %1348 = dma.hbm_to_vmem [thread:$0]  (!%p1992_p2), %s2066_s11, 256, %s2068_s28, %s283_s7, %s1757_s10, %s2413_s18, %s2416_s14  }
  0xa1   : > { %306 = sbr.rel (%p2419_p12) target bundleno = 882 (0x372), region = 40  ;;  %s2101_s17 = sand.u32 (!%p2419_p12), 1, %s1723_s24  }
  0xa2   : > { %s1171_s16 = sshll.u32 (!%p2419_p12), %s2101_s17, 3  ;;  %s309_s26 = scalar_lea.sflag (!%p2419_p12), [#allocation4], %s2101_s17 }
  0xa3   : > { %s312_s19 = scalar_lea.vmem (!%p2419_p12), [#allocation3], %s1171_s16  ;;  %p2420_p10 = scmp.ne.s32.totalorder (!%p2419_p12), %s2407_s12, 0 }
  0xa8   : > { %1690 = dma.done.wait (%p2420_p10), %s309_s26, 128  }
  0xa9   : > { %1692 = vsyncadd (%p2420_p10), %s309_s26, 4294967168  ;;  %s2421_s1 = sld [smem:[#allocation21_spill]]  ;;  %s2422_s4 = sld [smem:[#allocation16_spill]] }
  0xaa   : > { %s2423_s18 = sld [smem:[#allocation22_spill]] }
  0xaf   : > { %s317_s14 = sand.u32 1, %s2421_s1   ;;  %s319_s8 = sand.u32 1, %s2422_s4  }
  0xb0   : > { %s1172_s11 = sshll.u32 %s319_s8, 4  ;;  %s318_s28 = scalar_lea.sflag [#allocation7], %s317_s14 }
  0xb1   : > { %s321_s7 = scalar_lea.vmem [#allocation6], %s1172_s11  ;;  %p2424_p2 = scmp.ne.s32.totalorder %s2423_s18, 0 }
  0xb3   : > { %1694 = dma.done.wait (%p2424_p2), %s318_s28, 768  }
  0xb4   : > { %1696 = vsyncadd (%p2424_p2), %s318_s28, 4294966528  ;;  %s1173_s15 = sshll.u32 %s319_s8, 5  ;;  %s1174_s21 = sshll.u32 %s2101_s17, 4 }
  0xb5   : > { %s2116_s30 = scalar_lea.vmem [#allocation8], %s1173_s15  ;;  %s336_s20 = scalar_lea.sflag [#allocation10], %s2101_s17 }
  0xb6   : > { %s2121_s13 = scalar_lea.vmem [#allocation9], %s1174_s21 }
  0xb7   : > { %1698 = dma.done.wait (%p2420_p10), %s336_s20, 256  }
  0xb8   : > { %1700 = vsyncadd (%p2420_p10), %s336_s20, 4294967040  ;;  %v1452_v0 = vld [vmem:[%s321_s7] ss:$8 sps:$4 sm:$0xff]   ;;  %v1453_v2 = vld [vmem:[%s321_s7 + $0x4] ss:$8 sps:$4 sm:$0xff]   ;;  %vm418_vm0 = vcmask 130048  }
  0xb9   : > { %396 = vxpose.xlu0.c.b16.start.end [1/1] (short) %v1452_v0, 128  ;;  %v1454_v1 = vld [vmem:[%s312_s19] sm:$0xff]   ;;  %v1455_v19 = vld [vmem:[%s2116_s30] ss:$8 sps:$4 sm:$0xff]   ;;  %s2425_s12 = sld [smem:[#allocation19_spill]]  ;;  %s2426_s9 = sld [smem:[#allocation18_spill]] }
  0xba   : > { %1250 = vmatprep.subr.bf16.mxu0 %v1454_v1  ;;  %1284 = vmatprep.mubr.bf16.mxu1 %v1455_v19  ;;  %s967_s6 = sld [smem:[#allocation2]]  ;;  %s380_s26 = scalar_lea.vmem [#allocation11], %s1174_s21 }
  0xbb   : > { %1251 = vmatpush3.bf16.msra.mxu0 %v1454_v1  ;;  %s998_s19 = sshll.u32 %s380_s26, 4  ;;  %s2427_s1 = sld [smem:[#allocation24_spill]]  ;;  %s2288_s19 = int_to_ptr.vmem [resolvable:$true] %s998_s19 }
  0xbc   : > { %1288 = vmatprep.subr.bf16.mxu0 %v1454_v1  ;;  %s2428_s8 = sld [smem:[#allocation28_spill]]  ;;  %s984_s28 = scalar_lea.sflag [#allocation5], %s2101_s17 }
  0xbd   : > { %s1617_s7 = scalar_lea.vmem %s2288_s19, 256  ;;  %s1758_s15 = smov [#allocation11]  }
  0xbe   : > { %p1618_p6 = scmp.ne.s32.totalorder %s2288_s19, %s1617_s7  ;;  %s1621_s21 = sshll.u32 %s1758_s15, 4  ;;  %s1622_s21 = int_to_ptr.vmem [resolvable:$false] %s1621_s21 }
  0xbf   : > { %s1206_s10 = sshll.u32 %s2425_s12, 2  ;;  %p1624_p9 = scmp.lt.s32.totalorder %s2288_s19, %s1622_s21 }
  0xc0   : > { %s995_s16 = sadd.s32 %s2426_s9, %s1206_s10 }
  0xc1   : > { %s1207_s4 = sshll.u32 %s995_s16, 7  ;;  %p2429_p4 = scmp.ne.s32.totalorder %s2427_s1, 0 }
  0xc2   : > { %s2293_s11 = scalar_lea.hbm %s2428_s8, %s1207_s4 }
  0xc3   : > { %p1619_p3 = pnand %p1618_p6, %p2429_p4 }
  0xc5   : > { %p1620_p5 = pneg %p1619_p3 }
  0xd6   : > { %690 = vxpose.xlu0.c.b16.start.end [1/1] (short) %v1453_v2, 128 }
 0x11f   : > { %v404_v3 = vpop.trf.xlu0 }
 0x120   : > { %1252 = vmatprep.mubr.msk.bf16.mxu0 %vm418_vm0, %v404_v3 }
 0x123   : > { %v405_v4 = vpop.trf.xlu0 }
 0x124   : > { %1253 = vmatmul.mubr.msk.bf16.vlgmr.msra.gmra.mrb[0].mxu0 %vm418_vm0, %v405_v4 }
 0x125   : > { %1289 = vmatpush3.bf16.msra.mxu0 %v1454_v1 }
 0x127   : > { %v406_v5 = vpop.trf.xlu0 }
 0x128   : > { %1256 = vmatprep.mubr.msk.bf16.mxu0 %vm418_vm0, %v406_v5 }
 0x12b   : > { %v407_v6 = vpop.trf.xlu0 }
 0x12c   : > { %1257 = vmatmul.mubr.msk.bf16.gmra.mrb[4].mxu0 %vm418_vm0, %v407_v6 }
 0x12f   : > { %v408_v7 = vpop.trf.xlu0 }
 0x130   : > { %1260 = vmatprep.mubr.msk.bf16.mxu0 %vm418_vm0, %v408_v7 }
 0x133   : > { %v409_v8 = vpop.trf.xlu0 }
 0x134   : > { %1261 = vmatmul.mubr.msk.bf16.gmra.mrb[8].mxu0 %vm418_vm0, %v409_v8 }
 0x137   : > { %v410_v9 = vpop.trf.xlu0 }
 0x138   : > { %1264 = vmatprep.mubr.msk.bf16.mxu0 %vm418_vm0, %v410_v9 }
 0x13b   : > { %v411_v10 = vpop.trf.xlu0 }
 0x13c   : > { %1265 = vmatmul.mubr.msk.bf16.gmra.mrb[12].mxu0 %vm418_vm0, %v411_v10 }
 0x13f   : > { %v698_v11 = vpop.trf.xlu0 }
 0x140   : > { %1290 = vmatprep.mubr.msk.bf16.mxu0 %vm418_vm0, %v698_v11 }
 0x143   : > { %v699_v12 = vpop.trf.xlu0 }
 0x144   : > { %1291 = vmatmul.mubr.msk.bf16.vlgmr.msra.gmra.mrb[16].mxu0 %vm418_vm0, %v699_v12 }
 0x147   : > { %v700_v13 = vpop.trf.xlu0 }
 0x148   : > { %1294 = vmatprep.mubr.msk.bf16.mxu0 %vm418_vm0, %v700_v13 }
 0x14b   : > { %v701_v14 = vpop.trf.xlu0 }
 0x14c   : > { %1295 = vmatmul.mubr.msk.bf16.gmra.mrb[20].mxu0 %vm418_vm0, %v701_v14 }
 0x14f   : > { %v702_v15 = vpop.trf.xlu0 }
 0x150   : > { %1298 = vmatprep.mubr.msk.bf16.mxu0 %vm418_vm0, %v702_v15 }
 0x153   : > { %v703_v16 = vpop.trf.xlu0 }
 0x154   : > { %1299 = vmatmul.mubr.msk.bf16.gmra.mrb[24].mxu0 %vm418_vm0, %v703_v16 }
 0x157   : > { %v704_v17 = vpop.trf.xlu0 }
 0x158   : > { %1302 = vmatprep.mubr.msk.bf16.mxu0 %vm418_vm0, %v704_v17 }
 0x15b   : > { %v705_v18 = vpop.trf.xlu0 }
 0x15c   : > { %1303 = vmatmul.mubr.msk.bf16.gmra.mrb[28].mxu0 %vm418_vm0, %v705_v18 }
 0x1f7   : > { %v2144_v20 = vpop.f32.mrb[0].mxu0 }
 0x1f8   : > { %v477_v21 = vpop.f32.mrb[1].mxu0 }
 0x1f9   : > { %v2146_v22 = vpop.f32.mrb[2].mxu0 }
 0x1fa   : > { %v480_v23 = vpop.f32.mrb[3].mxu0 }
 0x1ff   : > { %v2148_v24 = vpop.f32.mrb[4].mxu0 }
 0x200   : > { %v542_v25 = vmax.f32 %v2144_v20, %v2148_v24  ;;  %v493_v26 = vpop.f32.mrb[5].mxu0 }
 0x201   : > { %v540_v27 = vmax.f32 %v477_v21, %v493_v26  ;;  %v2152_v28 = vpop.f32.mrb[6].mxu0 }
 0x202   : > { %v543_v29 = vmax.f32 %v2146_v22, %v2152_v28  ;;  %v496_v30 = vpop.f32.mrb[7].mxu0 }
 0x203   : > { %v541_v31 = vmax.f32 %v480_v23, %v496_v30 }
 0x207   : > { %v2156_v32 = vpop.f32.mrb[8].mxu0 }
 0x208   : > { %v546_v33 = vmax.f32 %v542_v25, %v2156_v32  ;;  %v2159_v34 = vpop.f32.mrb[9].mxu0 }
 0x209   : > { %v544_v35 = vmax.f32 %v540_v27, %v2159_v34  ;;  %v2162_v36 = vpop.f32.mrb[10].mxu0 }
 0x20a   : > { %v547_v37 = vmax.f32 %v543_v29, %v2162_v36  ;;  %v512_v38 = vpop.f32.mrb[11].mxu0 }
 0x20b   : > { %v545_v39 = vmax.f32 %v541_v31, %v512_v38 }
 0x20f   : > { %v2165_v40 = vpop.f32.mrb[12].mxu0 }
 0x210   : > { %v550_v41 = vmax.f32 %v546_v33, %v2165_v40  ;;  %v525_v42 = vpop.f32.mrb[13].mxu0 }
 0x211   : > { %v548_v43 = vmax.f32 %v544_v35, %v525_v42  ;;  %v2168_v44 = vpop.f32.mrb[14].mxu0 }
 0x212   : > { %v551_v45 = vmax.f32 %v547_v37, %v2168_v44  ;;  %v528_v46 = vpop.f32.mrb[15].mxu0 }
 0x213   : > { %v549_v47 = vmax.f32 %v545_v39, %v528_v46 }
 0x214   : > { %v553_v48 = vmax.f32 %v550_v41, %v551_v45 }
 0x215   : > { %v552_v49 = vmax.f32 %v548_v43, %v549_v47 }
 0x217   : > { %v554_v50 = vmax.f32 %v552_v49, %v553_v48  ;;  %v2171_v51 = vpop.f32.mrb[16].mxu0 }
 0x218   : > { %v2173_v52 = vpop.f32.mrb[17].mxu0 }
 0x219   : > { %v555_v53 = vrot.slane %v554_v50, 4  ;;  %v2175_v54 = vpop.f32.mrb[18].mxu0 }
 0x21a   : > { %v2177_v55 = vpop.f32.mrb[19].mxu0 }
 0x21b   : > { %v556_v56 = vmax.f32 %v554_v50, %v555_v53 }
 0x21d   : > { %v557_v57 = vrot.slane %v556_v56, 2 }
 0x21f   : > { %v558_v58 = vmax.f32 %v556_v56, %v557_v57  ;;  %v2179_v59 = vpop.f32.mrb[20].mxu0 }
 0x220   : > { %v829_v60 = vmax.f32 %v2171_v51, %v2179_v59  ;;  %v2183_v61 = vpop.f32.mrb[21].mxu0 }
 0x221   : > { %v559_v62 = vrot.slane %v558_v58, 1  ;;  %v827_v63 = vmax.f32 %v2173_v52, %v2183_v61  ;;  %v2187_v0 = vpop.f32.mrb[22].mxu0 }
 0x222   : > { %v830_v1 = vmax.f32 %v2175_v54, %v2187_v0  ;;  %v2191_v2 = vpop.f32.mrb[23].mxu0 }
 0x223   : > { %v2193_v3 = vmax.f32 %v558_v58, %v559_v62  ;;  %v828_v4 = vmax.f32 %v2177_v55, %v2191_v2 }
 0x225   : > { %v576_v5 = vsub.f32 %v525_v42, %v2193_v3  ;;  %v577_v6 = vsub.f32 %v528_v46, %v2193_v3  ;;  %v564_v7 = vsub.f32 %v477_v21, %v2193_v3  ;;  %v565_v8 = vsub.f32 %v480_v23, %v2193_v3 }
 0x226   : > { %v566_v9 = vsub.f32 %v2144_v20, %v2193_v3  ;;  %v567_v10 = vsub.f32 %v2146_v22, %v2193_v3  ;;  %v568_v11 = vsub.f32 %v493_v26, %v2193_v3  ;;  %v569_v12 = vsub.f32 %v496_v30, %v2193_v3 }
 0x227   : > { %v2207_v13 = vpack.c.bf16 %v577_v6, %v576_v5  ;;  %v2209_v14 = vpop.f32.mrb[24].mxu0  ;;  %v580_v15 = vpack.c.bf16 %v565_v8, %v564_v7  ;;  %v570_v16 = vsub.f32 %v2148_v24, %v2193_v3  ;;  %v571_v17 = vsub.f32 %v2152_v28, %v2193_v3 }
 0x228   : > { %v833_v18 = vmax.f32 %v829_v60, %v2209_v14  ;;  %v2216_v19 = vpop.f32.mrb[25].mxu0  ;;  %v581_v20 = vpack.c.bf16 %v567_v10, %v566_v9  ;;  %v582_v21 = vpack.c.bf16 %v569_v12, %v568_v11  ;;  %v572_v22 = vsub.f32 %v2159_v34, %v2193_v3 }
 0x229   : > { %v831_v23 = vmax.f32 %v827_v63, %v2216_v19  ;;  %v2221_v25 = vpop.f32.mrb[26].mxu0  ;;  %v589_v26 = vmul.bf16 1069105081, %v580_v15  ;;  %v583_v27 = vpack.c.bf16 %v571_v17, %v570_v16  ;;  %v573_v30 = vsub.f32 %v512_v38, %v2193_v3 }
 0x22a   : > { %v834_v24 = vmax.f32 %v830_v1, %v2221_v25  ;;  %v2224_v29 = vpop.f32.mrb[27].mxu0  ;;  %v592_v28 = vmul.bf16 1069105081, %v581_v20  ;;  %v574_v33 = vsub.f32 %v2156_v32, %v2193_v3  ;;  %v575_v35 = vsub.f32 %v2162_v36, %v2193_v3 }
 0x22b   : > { %v832_v31 = vmax.f32 %v828_v4, %v2224_v29  ;;  %1459 = vpow.bf16 %v589_v26  ;;  %v584_v34 = vpack.c.bf16 %v573_v30, %v572_v22  ;;  %v578_v37 = vsub.f32 %v2165_v40, %v2193_v3 }
 0x22c   : > { %v579_v39 = vsub.f32 %v2168_v44, %v2193_v3  ;;  %1461 = vpow.bf16 %v592_v28  ;;  %v595_v41 = vmul.bf16 1069105081, %v582_v21  ;;  %v585_v42 = vpack.c.bf16 %v575_v35, %v574_v33 }
 0x22d   : > { %v598_v40 = vmul.bf16 1069105081, %v583_v27  ;;  %v601_v53 = vmul.bf16 1069105081, %v584_v34  ;;  %v607_v5 = vmul.bf16 1069105081, %v2207_v13 }
 0x22e   : > { %v587_v43 = vpack.c.bf16 %v579_v39, %v578_v37  ;;  %1463 = vpow.bf16 %v595_v41  ;;  %v604_v62 = vmul.bf16 1069105081, %v585_v42  ;;  %v1457_v42 = vld [vmem:[%s2116_s30 + $0x4] ss:$8 sps:$4 sm:$0xff]  }
 0x22f   : > { %v2236_v38 = vpop.f32.mrb[28].mxu0  ;;  %1465 = vpow.bf16 %v598_v40 }
 0x230   : > { %v837_v45 = vmax.f32 %v833_v18, %v2236_v38  ;;  %v812_v32 = vpop.f32.mrb[29].mxu0  ;;  %1467 = vpow.bf16 %v601_v53  ;;  %v610_v9 = vmul.bf16 1069105081, %v587_v43  ;;  %v1458_v53 = vld [vmem:[%s2116_s30 + $0x14] ss:$8 sps:$4 sm:$0xff]  }
 0x231   : > { %v835_v46 = vmax.f32 %v831_v23, %v812_v32  ;;  %v2239_v47 = vpop.f32.mrb[30].mxu0  ;;  %1469 = vpow.bf16 %v604_v62 }
 0x232   : > { %v838_v36 = vmax.f32 %v834_v24, %v2239_v47  ;;  %v815_v48 = vpop.f32.mrb[31].mxu0  ;;  %1471 = vpow.bf16 %v607_v5 }
 0x233   : > { %v836_v49 = vmax.f32 %v832_v31, %v815_v48  ;;  %1473 = vpow.bf16 %v610_v9 }
 0x234   : > { %v840_v50 = vmax.f32 %v837_v45, %v838_v36 }
 0x235   : > { %v839_v44 = vmax.f32 %v835_v46, %v836_v49 }
 0x236   : > { %v1460_v56 = vpop.eup %1459 }
 0x237   : > { %v841_v57 = vmax.f32 %v839_v44, %v840_v50  ;;  %1268 = vmatprep.subr.bf16.mxu1 %v1460_v56  ;;  %v1462_v58 = vpop.eup %1461 }
 0x238   : > { %1269 = vmatpush3.bf16.msra.mxu1 %v1460_v56  ;;  %v561_v56 = vsub.f32 -inf, %v2193_v3 }
 0x239   : > { %v842_v60 = vrot.slane %v841_v57, 4  ;;  %1270 = vmatprep.subr.bf16.mxu1 %v1462_v58  ;;  %v1464_v1 = vpop.eup %1463 }
 0x23a   : > { %v1466_v7 = vpop.eup %1465 }
 0x23b   : > { %v843_v63 = vmax.f32 %v841_v57, %v842_v60  ;;  %v1468_v11 = vpop.eup %1467  ;;  %v562_v57 = vmul.f32 1.442695, %v561_v56 }
 0x23c   : > { %1271 = vmatpush3.bf16.msra.mxu1 %v1462_v58  ;;  %v1470_v23 = vpop.eup %1469 }
 0x23d   : > { %v844_v4 = vrot.slane %v843_v63, 2  ;;  %1272 = vmatprep.subr.bf16.mxu1 %v1464_v1 }
 0x23f   : > { %v845_v6 = vmax.f32 %v843_v63, %v844_v4 }
 0x240   : > { %1273 = vmatpush3.bf16.msra.mxu1 %v1464_v1 }
 0x241   : > { %v846_v8 = vrot.slane %v845_v6, 1  ;;  %1274 = vmatprep.subr.bf16.mxu1 %v1466_v7 }
 0x243   : > { %v847_v10 = vmax.f32 %v845_v6, %v846_v8 }
 0x244   : > { %1275 = vmatpush3.bf16.msra.mxu1 %v1466_v7 }
 0x245   : > { %v2244_v12 = vmax.f32 %v2193_v3, %v847_v10  ;;  %1276 = vmatprep.subr.bf16.mxu1 %v1468_v11 }
 0x247   : > { %v864_v15 = vsub.f32 %v812_v32, %v2244_v12  ;;  %v865_v13 = vsub.f32 %v815_v48, %v2244_v12  ;;  %v852_v16 = vsub.f32 %v2173_v52, %v2244_v12  ;;  %v853_v17 = vsub.f32 %v2177_v55, %v2244_v12 }
 0x248   : > { %v854_v18 = vsub.f32 %v2171_v51, %v2244_v12  ;;  %v855_v20 = vsub.f32 %v2175_v54, %v2244_v12  ;;  %v856_v21 = vsub.f32 %v2183_v61, %v2244_v12  ;;  %v857_v22 = vsub.f32 %v2191_v2, %v2244_v12  ;;  %1277 = vmatpush3.bf16.msra.mxu1 %v1468_v11 }
 0x249   : > { %v874_v26 = vpack.c.bf16 %v865_v13, %v864_v15  ;;  %v868_v27 = vpack.c.bf16 %v853_v17, %v852_v16  ;;  %v858_v52 = vsub.f32 %v2179_v59, %v2244_v12  ;;  %v859_v55 = vsub.f32 %v2187_v0, %v2244_v12  ;;  %1278 = vmatprep.subr.bf16.mxu1 %v1470_v23  ;;  %v1472_v0 = vpop.eup %1471 }
 0x24a   : > { %v869_v51 = vpack.c.bf16 %v855_v20, %v854_v18  ;;  %v870_v24 = vpack.c.bf16 %v857_v22, %v856_v21  ;;  %v860_v54 = vsub.f32 %v2216_v19, %v2244_v12  ;;  %v861_v61 = vsub.f32 %v2224_v29, %v2244_v12  ;;  %v1474_v39 = vpop.eup %1473 }
 0x24b   : > { %v877_v2 = vmul.bf16 1069105081, %v868_v27  ;;  %v871_v28 = vpack.c.bf16 %v859_v55, %v858_v52  ;;  %v862_v30 = vsub.f32 %v2209_v14, %v2244_v12  ;;  %v863_v59 = vsub.f32 %v2221_v25, %v2244_v12  ;;  %v1456_v25 = vld [vmem:[%s2116_s30 + $0x10] ss:$8 sps:$4 sm:$0xff]   ;;  %s1623_s30 = scalar_lea.vmem %s1622_s21, 512 }
 0x24c   : > { %v880_v31 = vmul.bf16 1069105081, %v869_v51  ;;  %v872_v33 = vpack.c.bf16 %v861_v61, %v860_v54  ;;  %1279 = vmatpush3.bf16.msra.mxu1 %v1470_v23  ;;  %v866_v34 = vsub.f32 %v2236_v38, %v2244_v12  ;;  %v867_v19 = vsub.f32 %v2239_v47, %v2244_v12  ;;  %v978_v54 = vld [vmem:[%s2121_s13 + $0x8] sm:$0xff]  ;;  %p1625_p0 = scmp.lt.s32.totalorder %s1623_s30, %s1617_s7 }
 0x24d   : > { %1280 = vmatprep.subr.bf16.mxu1 %v1472_v0  ;;  %1475 = vpow.bf16 %v877_v2  ;;  %v873_v29 = vpack.c.bf16 %v863_v59, %v862_v30  ;;  %v849_v14 = vsub.f32 %v2193_v3, %v2244_v12  ;;  %v883_v37 = vmul.bf16 1069105081, %v870_v24  ;;  %v977_v24 = vld [vmem:[%s2121_s13] sm:$0xff] }
 0x24e   : > { %v875_v35 = vpack.c.bf16 %v867_v19, %v866_v34  ;;  %1477 = vpow.bf16 %v880_v31  ;;  %v886_v41 = vmul.bf16 1069105081, %v871_v28  ;;  %v889_v38 = vmul.bf16 1069105081, %v872_v33  ;;  %p1626_p1 = por %p1625_p0, %p1624_p9 }
 0x24f   : > { %1479 = vpow.bf16 %v883_v37  ;;  %v892_v32 = vmul.bf16 1069105081, %v873_v29  ;;  %v895_v47 = vmul.bf16 1069105081, %v874_v26  ;;  %v850_v58 = vmul.f32 1.442695, %v849_v14 }
 0x250   : > { %1281 = vmatpush3.bf16.msra.mxu1 %v1472_v0  ;;  %1481 = vpow.bf16 %v886_v41  ;;  %v898_v48 = vmul.bf16 1069105081, %v875_v35  ;;  %v968_v17 = vlaneseq  ;;  %v974_v52 = vstv %s967_s6  ;;  %p1627_p8 = pnand %p1626_p1, %p1620_p5 }
 0x251   : > { %1282 = vmatprep.subr.bf16.mxu1 %v1474_v39  ;;  %1483 = vpow.bf16 %v889_v38 }
 0x252   : > { %1485 = vpow.bf16 %v892_v32  ;;  %v969_v22 = vshrl.u32 %v968_v17, 7 }
 0x253   : > { %1487 = vpow.bf16 %v895_v47 }
 0x254   : > { %1283 = vmatpush3.bf16.msra.mxu1 %v1474_v39  ;;  %1489 = vpow.bf16 %v898_v48  ;;  %v970_v23 = vsub.s32 0, %v969_v22 }
 0x255   : > { %1491 = vpow2.f32 %v562_v57 }
 0x256   : > { %1493 = vpow2.f32 %v850_v58 }
 0x257   : > { %1285 = vmatmul.mubr.bf16.vlgmr.msra.gmra.mrb[0].mxu1 %v1456_v25 }
 0x258   : > { %v1476_v43 = vpop.eup %1475  ;;  %1322 = vmatprep.mubr.bf16.mxu1 %v1457_v42 }
 0x259   : > { %1306 = vmatprep.subr.bf16.mxu1 %v1476_v43  ;;  %v1478_v45 = vpop.eup %1477 }
 0x25a   : > { %1307 = vmatpush3.bf16.msra.mxu1 %v1476_v43  ;;  %v1480_v46 = vpop.eup %1479 }
 0x25b   : > { %1308 = vmatprep.subr.bf16.mxu1 %v1478_v45  ;;  %v1482_v36 = vpop.eup %1481 }
 0x25c   : > { %v1484_v40 = vpop.eup %1483 }
 0x25d   : > { %v1486_v49 = vpop.eup %1485 }
 0x25e   : > { %1309 = vmatpush3.bf16.msra.mxu1 %v1478_v45  ;;  %v1488_v50 = vpop.eup %1487 }
 0x25f   : > { %1310 = vmatprep.subr.bf16.mxu1 %v1480_v46  ;;  %v1490_v44 = vpop.eup %1489 }
 0x260   : > { %v1492_v60 = vpop.eup %1491 }
 0x261   : > { %v612_v62 = vmul.f32 0.0, %v1492_v60  ;;  %v1494_v5 = vpop.eup %1493 }
 0x262   : > { %1311 = vmatpush3.bf16.msra.mxu1 %v1480_v46 }
 0x263   : > { %1312 = vmatprep.subr.bf16.mxu1 %v1482_v36 }
 0x266   : > { %1313 = vmatpush3.bf16.msra.mxu1 %v1482_v36 }
 0x267   : > { %1314 = vmatprep.subr.bf16.mxu1 %v1484_v40 }
 0x26a   : > { %1315 = vmatpush3.bf16.msra.mxu1 %v1484_v40 }
 0x26b   : > { %1316 = vmatprep.subr.bf16.mxu1 %v1486_v49 }
 0x26e   : > { %1317 = vmatpush3.bf16.msra.mxu1 %v1486_v49 }
 0x26f   : > { %1318 = vmatprep.subr.bf16.mxu1 %v1488_v50 }
 0x272   : > { %1319 = vmatpush3.bf16.msra.mxu1 %v1488_v50 }
 0x273   : > { %1320 = vmatprep.subr.bf16.mxu1 %v1490_v44 }
 0x276   : > { %1321 = vmatpush3.bf16.msra.mxu1 %v1490_v44 }
 0x279   : > { %1323 = vmatmul.mubr.bf16.vlgmr.msra.gmra.mrb[4].mxu1 %v1458_v53 }
 0x32a   : > { %v1286_v63 = vpop.f32.mrb[0].mxu1 }
 0x32b   : > { %v675_v1 = vadd.f32 %v1286_v63, %v612_v62  ;;  %v659_v4 = vpop.f32.mrb[1].mxu1 }
 0x32c   : > { %v673_v6 = vadd.f32 %v659_v4, %v612_v62  ;;  %v1287_v7 = vpop.f32.mrb[2].mxu1 }
 0x32d   : > { %v662_v8 = vpop.f32.mrb[3].mxu1  ;;  %v902_v9 = vmul.f32 %v1494_v5, %v675_v1 }
 0x32e   : > { %v674_v10 = vadd.f32 %v662_v8, %v612_v62  ;;  %v900_v11 = vmul.f32 %v1494_v5, %v673_v6 }
 0x330   : > { %v901_v12 = vmul.f32 %v1494_v5, %v674_v10 }
 0x34c   : > { %v1324_v3 = vpop.f32.mrb[4].mxu1 }
 0x34d   : > { %v965_v15 = vadd.f32 %v1324_v3, %v902_v9  ;;  %v949_v13 = vpop.f32.mrb[5].mxu1 }
 0x34e   : > { %v963_v16 = vadd.f32 %v949_v13, %v900_v11  ;;  %v1325_v18 = vpop.f32.mrb[6].mxu1 }
 0x34f   : > { %1495 = vrcp.f32 %v965_v15  ;;  %v952_v20 = vpop.f32.mrb[7].mxu1 }
 0x350   : > { %v964_v21 = vadd.f32 %v952_v20, %v901_v12 }
 0x359   : > { %v1496_v26 = vpop.eup %1495 }
 0x35a   : > { %v971_v27 = vrot.slane %v1496_v26, %v970_v23 }
 0x35c   : > { %v972_v55 = vmul.f32 %v971_v27, %v963_v16  ;;  %v973_v51 = vmul.f32 %v971_v27, %v964_v21 }
 0x35e   : > { %v975_v61 = vmul.f32 %v974_v52, %v972_v55  ;;  %v976_v2 = vmul.f32 %v974_v52, %v973_v51 }
 0x360   : > { %v979_v28 = vadd.f32 %v977_v24, %v975_v61  ;;  %v980_v30 = vadd.f32 %v978_v54, %v976_v2 }
 0x362   : > { %981 = vst [vmem:[%s380_s26] sm:$0xff] %v979_v28  ;;  %982 = vst [vmem:[%s380_s26 + $0x8] sm:$0xff] %v980_v30 }
 0x363   : > { %1630 = shalt.err (!%p1627_p8)
}
 0x364   : > { %s1631_s20 = scalar_lea.hbm %s2293_s11, 256  ;;  %s1635_s9 = scalar_lea.hbm %s2428_s8, 1024 }
 0x365   : > { %p1632_p7 = scmp.ne.s32.totalorder %s2293_s11, %s1631_s20  ;;  %p1636_p12 = scmp.lt.u32.totalorder %s2293_s11, %s2428_s8 }
 0x366   : > { %p1637_p10 = scmp.lt.u32.totalorder %s1635_s9, %s1631_s20  ;;  %p1639_p6 = scmp.lt.u32.totalorder %s1631_s20, %s2293_s11 }
 0x367   : > { %p1633_p11 = pnand %p1632_p7, %p2429_p4 }
 0x368   : > { %p1638_p2 = por %p1637_p10, %p1636_p12 }
 0x369   : > { %p1634_p13 = pneg %p1633_p11 }
 0x36a   : > { %p1640_p3 = por %p1639_p6, %p1638_p2 }
 0x36c   : > { %p1641_p5 = pnand %p1640_p3, %p1634_p13 }
 0x36e   : > { %1644 = shalt.err (!%p1641_p5)
}
 0x36f   : > { %s1759_s16 = smov 128   ;;  %s1760_s26 = smov 256  }
 0x370   : > { %s1761_s4 = smov 8  }
 0x371   : > { %1334 = dma.vmem_to_hbm [thread:$0]  (%p2429_p4), %s2288_s19, 256, %s2293_s11, %s984_s28, %s1759_s16, %s1760_s26, %s1761_s4  }
 0x372 PF: > { %s2430_s18 = sld [smem:[#allocation17_spill]]  ;;  %s2431_s14 = sld [smem:[#allocation26_spill]] }
 0x373   : > { %p1354_p9 = scmp.ge.s32.totalorder %s1747_s29, 2 }
 0x378   : > { %s1013_s7 = sand.u32 1, %s2430_s18   ;;  %p2432_p0 = scmp.ne.s32.totalorder %s2431_s14, 0 }
 0x379   : > { %s1014_s15 = scalar_lea.sflag [#allocation5], %s1013_s7 }
 0x37a   : > { %p1350_p1 = pnand %p1354_p9, %p2432_p0 }
 0x37c   : > { %1702 = dma.done.wait (!%p1350_p1), %s1014_s15, 256  }
 0x37d   : > { %1704 = vsyncadd (!%p1350_p1), %s1014_s15, 4294967040  ;;  %s28_s29 = sadd.s32 1, %s1747_s29   ;;  %s2433_s20 = sld [smem:[#allocation16_spill]] }
 0x37e   : > { %p25_p8 = scmp.ge.s32.totalorder %s28_s29, 6   ;;  %s2434_s26 = sld [smem:[#allocation20_spill]] }
 0x37f   : > { %s2435_s17 = sld [smem:[#allocation23_spill]]  ;;  %s2436_s28 = sld [smem:[#allocation25_spill]] }
 0x380   : > { %s2437_s21 = smov %s1715_s22  ;;  %s2438_s22 = smov %s1970_s23 }
 0x381   : > { %s2439_s23 = smov %s1723_s24  ;;  %s2440_s24 = smov %s1727_s25 }
 0x382   : > { %s2441_s25 = smov %s1973_s5  ;;  %s2442_s4 = smov %s1739_s27 }
 0x383   :  { %27 = sbr.rel (!%p25_p8) target bundleno = 17 (0x11), region = 124 }
 0x385   : > { %s2443_s27 = smov %s2435_s17 }
 0x38a   :  { %1019 = vsyncpa [#allocation4], 1 }
 0x38b   :  { %1021 = vsyncpa [#allocation4 + $0x1], 1 }
 0x38c   :  { %1022 = vsyncpa [#allocation7], 1 }
 0x38d   :  { %1024 = vsyncpa [#allocation7 + $0x1], 1 }
 0x38e   :  { %1025 = vsyncpa [#allocation10], 1 }
 0x38f   :  { %1027 = vsyncpa [#allocation10 + $0x1], 1 }
 0x390   :  { %1028 = vsyncpa [#allocation5], 1 }
 0x391   :  { %1030 = vsyncpa [#allocation5 + $0x1], 1 }

</bundles_post_ra>
